<compile_context>
chip_gen: v5e
topology: v5e:2x2
jax: 0.10.0
libtpu: 0.0.40
codegen_flags: <defaults>
</compile_context>

<pallas_src>
import jax
import jax.numpy as jnp
from jax.experimental import pallas as pl
from jax.experimental.pallas import tpu as pltpu


def _round_up(a, b):
    return (a + b - 1) // b * b


def _tensorcores_per_chip():
    """Best-effort TensorCores-per-chip detection (v7x = 2, v5e/v6e = 1).

    Only influences the tiling heuristic, never correctness, and can never
    raise on exotic backends."""
    try:
        dev = jax.devices()[0]
        if dev.platform != "tpu":
            return 1
        if "v7" in str(getattr(dev, "device_kind", "")).lower():
            return 2
    except Exception:
        pass
    return 1


def _encoder_mlp_kernel(x_ref, w1_ref, b1_ref, w2_ref, b2_ref, w3_ref, b3_ref, o_ref):
    # Hoist bias loads once per body (JAX does not CSE broadcast_in_dim).
    b1 = b1_ref[...]
    b2 = b2_ref[...]
    b3 = b3_ref[...]
    # x arrives in its original f32; cast to the bf16 MXU operand dtype here so
    # the wrapper never makes an extra HBM cast pass.
    x = x_ref[...].astype(w1_ref.dtype)
    # Conv1d(1, O, kernel=I, stride=I) == per-time-step linear (I -> O), ReLU.
    h1 = jnp.dot(x, w1_ref[...], preferred_element_type=jnp.float32) + b1
    h1 = jnp.maximum(h1, 0.0).astype(w2_ref.dtype)
    # Conv1d(O, O, 1, 1) == pointwise linear (O -> O), ReLU.
    h2 = jnp.dot(h1, w2_ref[...], preferred_element_type=jnp.float32) + b2
    h2 = jnp.maximum(h2, 0.0).astype(w3_ref.dtype)
    # Linear(O, O).
    out = jnp.dot(h2, w3_ref[...], preferred_element_type=jnp.float32) + b3
    o_ref[...] = out.astype(o_ref.dtype)


def pack_encoder_params(params, *, input_size, output_size,
                        compute_dtype=jnp.bfloat16, lane_width=128):
    """One-time parameter packing; call at load time, NOT per forward.

    Folds P = lane_width // O tokens into one lane-dense row by making the
    weights block-diagonal (kron(I_P, W)) and tiling the biases; per-token math
    is unchanged.  Feature widths that divide neither into nor by lane_width
    fall back to P=1 and zero-pad only the last layer's output columns up to
    lane_width so output stores stay unmasked.  lane_width=256 would fill the
    full v6e/v7x MXU tile if the kernel ever became compute-bound."""
    w1t, b1, w2t, b2, w3t, b3 = params
    I, O = input_size, output_size
    if O % lane_width == 0:
        P = 1
    elif lane_width % O == 0:
        P = lane_width // O
    else:
        P = 1
    d_in, d_mid = P * I, P * O
    d_out = d_mid if d_mid % lane_width == 0 else _round_up(d_mid, lane_width)

    eye_p = jnp.eye(P, dtype=jnp.float32)
    w1b = jnp.kron(eye_p, w1t.astype(jnp.float32)).astype(compute_dtype)
    w2b = jnp.kron(eye_p, w2t.astype(jnp.float32)).astype(compute_dtype)
    w3b = jnp.kron(eye_p, w3t.astype(jnp.float32))
    b1b = jnp.tile(b1.astype(jnp.float32).reshape(1, O), (1, P))
    b2b = jnp.tile(b2.astype(jnp.float32).reshape(1, O), (1, P))
    b3b = jnp.tile(b3.astype(jnp.float32).reshape(1, O), (1, P))
    if d_out != d_mid:  # pad last-layer output columns to a full 128-lane row
        w3b = jnp.pad(w3b, ((0, 0), (0, d_out - d_mid)))
        b3b = jnp.pad(b3b, ((0, 0), (0, d_out - d_mid)))
    w3b = w3b.astype(compute_dtype)

    return dict(w1=w1b, b1=b1b, w2=w2b, b2=b2b, w3=w3b, b3=b3b,
                P=P, d_in=d_in, d_mid=d_mid, d_out=d_out,
                input_size=I, output_size=O)


def conv_attention_encoder_forward(x, packed, *, time_steps,
                                   max_row_tile=4096,
                                   out_dtype=jnp.bfloat16,
                                   num_tensorcores=None,
                                   vmem_tile_budget_bytes=24 * 1024 * 1024):
    """x: (B, time_steps, input_size) float, flat order matching PyTorch's
    x.view(B, 1, input_size*time_steps) (features of one time step contiguous).
    Returns (B, time_steps, output_size) in out_dtype (bf16 by default)."""
    I = packed["input_size"]
    O = packed["output_size"]
    P, d_in, d_mid, d_out = packed["P"], packed["d_in"], packed["d_mid"], packed["d_out"]
    B = x.shape[0]
    assert x.shape[1] == time_steps and x.shape[2] == I
    M = B * time_steps

    # Token packing: contiguous reshape only (no HBM pass) in the common case.
    x_flat = x.reshape(M, I)
    pad_tokens = (-M) % P
    if pad_tokens:
        # TODO(synk): rare path — only when B*time_steps isn't a multiple of the
        # token pack factor P; costs one extra pass over x.
        x_flat = jnp.pad(x_flat, ((0, pad_tokens), (0, 0)))
    Mp = (M + pad_tokens) // P
    x_packed = x_flat.reshape(Mp, d_in)

    # ---- row tiling: big tiles amortize the ~0.35us per-grid-step overhead;
    # pl.cdiv grid + Pallas boundary masking handles the tail (no jnp.pad). ----
    SUB = 16  # keep row tiles multiples of the bf16 sublane pack
    row_tile = min(max_row_tile, _round_up(Mp, SUB))
    in_bytes = x_packed.dtype.itemsize
    out_bytes = jnp.dtype(out_dtype).itemsize
    per_row_vmem = 2 * (d_in * in_bytes + d_out * out_bytes)  # double-buffered x + out
    while row_tile > SUB and row_tile * per_row_vmem > vmem_tile_budget_bytes:
        row_tile = _round_up(row_tile // 2, SUB)

    # Only split the grid for a second TensorCore (v7x) and only when each core
    # still gets a large tile; on v5e/v6e (1 TC) a single maximal tile wins.
    if num_tensorcores is None:
        num_tensorcores = _tensorcores_per_chip()
    MIN_ROWS_PER_CORE = 2048
    if (num_tensorcores >= 2
            and pl.cdiv(Mp, row_tile) < num_tensorcores
            and Mp >= num_tensorcores * MIN_ROWS_PER_CORE):
        row_tile = _round_up(pl.cdiv(Mp, num_tensorcores), SUB)

    steps = pl.cdiv(Mp, row_tile)
    grid = (steps,)
    if num_tensorcores >= 2 and steps >= num_tensorcores:
        dim_sem = (pltpu.CORE_PARALLEL,)   # actually shards steps across the 2 v7x TCs
    else:
        dim_sem = (pltpu.PARALLEL,)

    w1b, b1b = packed["w1"], packed["b1"]
    w2b, b2b = packed["w2"], packed["b2"]
    w3b, b3b = packed["w3"], packed["b3"]

    bytes_x = Mp * d_in * in_bytes
    bytes_w = sum(int(a.size) * a.dtype.itemsize for a in (w1b, w2b, w3b, b1b, b2b, b3b))
    bytes_o = Mp * d_out * out_bytes
    cost = pl.CostEstimate(
        flops=2 * Mp * (d_in * d_mid + d_mid * d_mid + d_mid * d_out),
        transcendentals=0,
        bytes_accessed=bytes_x + bytes_w + bytes_o,
    )

    out = pl.pallas_call(
        _encoder_mlp_kernel,
        out_shape=jax.ShapeDtypeStruct((Mp, d_out), out_dtype),
        grid_spec=pltpu.PrefetchScalarGridSpec(
            num_scalar_prefetch=0,
            grid=grid,
            in_specs=[
                pl.BlockSpec((row_tile, d_in), lambda i: (i, 0)),   # x tile (streamed, f32)
                # Constant index_maps: Pallas keeps these blocks resident across
                # grid steps (no per-step re-DMA); only x / out are streamed.
                pl.BlockSpec((d_in, d_mid), lambda i: (0, 0)),       # W1 (block-diag, bf16)
                pl.BlockSpec((1, d_mid), lambda i: (0, 0)),          # b1 (tiled, f32)
                pl.BlockSpec((d_mid, d_mid), lambda i: (0, 0)),      # W2
                pl.BlockSpec((1, d_mid), lambda i: (0, 0)),          # b2
                pl.BlockSpec((d_mid, d_out), lambda i: (0, 0)),      # W3 (lane-padded cols)
                pl.BlockSpec((1, d_out), lambda i: (0, 0)),          # b3
            ],
            out_specs=pl.BlockSpec((row_tile, d_out), lambda i: (i, 0)),
        ),
        compiler_params=pltpu.CompilerParams(
            dimension_semantics=dim_sem,
            vmem_limit_bytes=32 * 1024 * 1024,  # <= v7x scoped default (64 MiB physical)
        ),
        cost_estimate=cost,
    )(x_packed, w1b, b1b, w2b, b2b, w3b, b3b)

    # Unpack: lane-pad columns / token-pad rows are only sliced when they exist.
    if d_out != d_mid:
        out = out[:, :d_mid]
    out_tokens = out.reshape(Mp * P, O)
    if pad_tokens:
        out_tokens = out_tokens[:M]
    return out_tokens.reshape(B, time_steps, O)


def init_params(key, input_size, output_size):
    """Deterministic synthetic parameters (shapes match the PyTorch module).
    Conv1d(1,O,I,I) weight (O,1,I) -> stored transposed as (I,O);
    Conv1d(O,O,1,1) weight (O,O,1) -> stored transposed as (O,O);
    Linear(O,O)     weight (O,O)   -> stored transposed as (O,O)."""
    k1, k2, k3, k4, k5, k6 = jax.random.split(key, 6)
    s1 = 1.0 / jnp.sqrt(input_size)
    s2 = 1.0 / jnp.sqrt(output_size)
    w1t = jax.random.uniform(k1, (input_size, output_size), jnp.float32, -s1, s1)
    b1 = jax.random.uniform(k2, (1, output_size), jnp.float32, -s1, s1)
    w2t = jax.random.uniform(k3, (output_size, output_size), jnp.float32, -s2, s2)
    b2 = jax.random.uniform(k4, (1, output_size), jnp.float32, -s2, s2)
    w3t = jax.random.uniform(k5, (output_size, output_size), jnp.float32, -s2, s2)
    b3 = jax.random.uniform(k6, (1, output_size), jnp.float32, -s2, s2)
    return (w1t, b1, w2t, b2, w3t, b3)
    # NOTE: self.attn (Conv1d(O,1,1,1)) from __init__ is unused in forward(), so it
    # is intentionally not materialized; encoding_mode is likewise unused.


def reference_forward_f32(x, params, *, input_size, output_size, time_steps):
    """Pure-JAX f32 reference mirroring the PyTorch forward exactly."""
    w1t, b1, w2t, b2, w3t, b3 = params
    B = x.shape[0]
    xf = x.reshape(B * time_steps, input_size)
    h1 = jnp.maximum(xf @ w1t + b1, 0.0)
    h2 = jnp.maximum(h1 @ w2t + b2, 0.0)
    out = h2 @ w3t + b3
    return out.reshape(B, time_steps, output_size)


def reference_forward_mixed(x, params, *, input_size, output_size, time_steps):
    """Mirrors the kernel's mixed precision (bf16 operands, f32 accumulate)."""
    w1t, b1, w2t, b2, w3t, b3 = params
    bf = jnp.bfloat16
    B = x.shape[0]
    xf = x.reshape(B * time_steps, input_size).astype(bf)
    h1 = jnp.dot(xf, w1t.astype(bf), preferred_element_type=jnp.float32) + b1
    h1 = jnp.maximum(h1, 0.0).astype(bf)
    h2 = jnp.dot(h1, w2t.astype(bf), preferred_element_type=jnp.float32) + b2
    h2 = jnp.maximum(h2, 0.0).astype(bf)
    out = jnp.dot(h2, w3t.astype(bf), preferred_element_type=jnp.float32) + b3
    return out.reshape(B, time_steps, output_size)


if __name__ == "__main__":
    def run_case(batch, time_steps, input_size, output_size, seed, **fwd_kwargs):
        key = jax.random.PRNGKey(seed)
        kx, kp = jax.random.split(key)
        # Equivalent to the PyTorch input that gets .view(B, 1, input_size*time_steps):
        # features of one time step are contiguous along the last axis.
        x = jax.random.normal(kx, (batch, time_steps, input_size), jnp.float32)
        params = init_params(kp, input_size, output_size)
        packed = pack_encoder_params(params, input_size=input_size, output_size=output_size)

        out = conv_attention_encoder_forward(x, packed, time_steps=time_steps, **fwd_kwargs)
        out = jax.block_until_ready(out)
        assert out.shape == (batch, time_steps, output_size)
        out_f32 = out.astype(jnp.float32)

        # Strict check against a reference applying the same mixed precision
        # (tolerance covers the bf16 output rounding).
        ref_mixed = reference_forward_mixed(
            x, params, input_size=input_size, output_size=output_size,
            time_steps=time_steps)
        assert jnp.allclose(out_f32, ref_mixed, atol=2e-2, rtol=2e-2), (
            f"mixed-precision mismatch (O={output_size})")

        # Loose sanity check against exact f32 PyTorch math (bf16 operands/output
        # introduce ~1% relative deviation).
        ref_f32 = reference_forward_f32(
            x, params, input_size=input_size, output_size=output_size,
            time_steps=time_steps)
        assert jnp.allclose(out_f32, ref_f32, atol=1e-1, rtol=1e-1), (
            f"f32 reference mismatch (O={output_size})")

    # Small shapes consistent with the module (single masked boundary block).
    run_case(batch=2, time_steps=8, input_size=16, output_size=32, seed=0)
    # Multi-step grid to exercise the streamed pipeline path.
    run_case(batch=4, time_steps=64, input_size=16, output_size=32, seed=1,
             max_row_tile=32)
    # Feature width dividing neither into nor by 128 -> lane-padded output path.
    run_case(batch=2, time_steps=8, input_size=16, output_size=48, seed=2)

    print("KERNEL_OK")
</pallas_src>

<mosaic_0001>
module attributes {stable_mosaic.version = 11 : i64} {
  func.func @_encoder_mlp_kernel(%arg0: i32, %arg1: memref<16x64xf32, #tpu.memory_space<vmem>>, %arg2: memref<64x128xbf16, #tpu.memory_space<vmem>>, %arg3: memref<1x128xf32, #tpu.memory_space<vmem>>, %arg4: memref<128x128xbf16, #tpu.memory_space<vmem>>, %arg5: memref<1x128xf32, #tpu.memory_space<vmem>>, %arg6: memref<128x128xbf16, #tpu.memory_space<vmem>>, %arg7: memref<1x128xf32, #tpu.memory_space<vmem>>, %arg8: memref<16x128xbf16, #tpu.memory_space<vmem>>) attributes {dimension_semantics = [#tpu.dimension_semantics<parallel>], iteration_bounds = array<i64: 1>, scalar_prefetch = 0 : i64, scratch_operands = 0 : i64, tpu.core_type = #tpu.core_type<tc>, window_params = [{transform_indices = @transform_0, window_bounds = array<i64: 16, 64>}, {pipeline_mode = #tpu.pipeline_mode<synchronous>, transform_indices = @transform_1, window_bounds = array<i64: 64, 128>}, {pipeline_mode = #tpu.pipeline_mode<synchronous>, transform_indices = @transform_2, window_bounds = array<i64: 1, 128>}, {pipeline_mode = #tpu.pipeline_mode<synchronous>, transform_indices = @transform_3, window_bounds = array<i64: 128, 128>}, {pipeline_mode = #tpu.pipeline_mode<synchronous>, transform_indices = @transform_4, window_bounds = array<i64: 1, 128>}, {pipeline_mode = #tpu.pipeline_mode<synchronous>, transform_indices = @transform_5, window_bounds = array<i64: 128, 128>}, {pipeline_mode = #tpu.pipeline_mode<synchronous>, transform_indices = @transform_6, window_bounds = array<i64: 1, 128>}, {transform_indices = @transform_7, window_bounds = array<i64: 16, 128>}]} {
    %c0 = arith.constant 0 : index
    %c0_0 = arith.constant 0 : index
    %0 = vector.load %arg3[%c0, %c0_0] : memref<1x128xf32, #tpu.memory_space<vmem>>, vector<1x128xf32>
    %c0_1 = arith.constant 0 : index
    %c0_2 = arith.constant 0 : index
    %1 = vector.load %arg5[%c0_1, %c0_2] : memref<1x128xf32, #tpu.memory_space<vmem>>, vector<1x128xf32>
    %c0_3 = arith.constant 0 : index
    %c0_4 = arith.constant 0 : index
    %2 = vector.load %arg7[%c0_3, %c0_4] : memref<1x128xf32, #tpu.memory_space<vmem>>, vector<1x128xf32>
    %c0_5 = arith.constant 0 : index
    %c0_6 = arith.constant 0 : index
    %3 = vector.load %arg1[%c0_5, %c0_6] : memref<16x64xf32, #tpu.memory_space<vmem>>, vector<16x64xf32>
    %4 = arith.truncf %3 : vector<16x64xf32> to vector<16x64xbf16>
    %c0_7 = arith.constant 0 : index
    %c0_8 = arith.constant 0 : index
    %5 = vector.load %arg2[%c0_7, %c0_8] : memref<64x128xbf16, #tpu.memory_space<vmem>>, vector<64x128xbf16>
    %cst = arith.constant dense<0.000000e+00> : vector<16x128xf32>
    %6 = tpu.matmul %4, %5, %cst {dimension_numbers = #tpu.dot_dimension_numbers<[1], [0], [0], [1], [0, 0, 1, 1], [], []>} : vector<16x64xbf16>, vector<64x128xbf16>, vector<16x128xf32> -> vector<16x128xf32>
    %7 = vector.broadcast %0 : vector<1x128xf32> to vector<16x128xf32>
    %8 = arith.addf %6, %7 : vector<16x128xf32>
    %cst_9 = arith.constant 0.000000e+00 : f32
    %9 = vector.broadcast %cst_9 : f32 to vector<16x128xf32>
    %10 = arith.maximumf %8, %9 : vector<16x128xf32>
    %11 = arith.truncf %10 : vector<16x128xf32> to vector<16x128xbf16>
    %c0_10 = arith.constant 0 : index
    %c0_11 = arith.constant 0 : index
    %12 = vector.load %arg4[%c0_10, %c0_11] : memref<128x128xbf16, #tpu.memory_space<vmem>>, vector<128x128xbf16>
    %cst_12 = arith.constant dense<0.000000e+00> : vector<16x128xf32>
    %13 = tpu.matmul %11, %12, %cst_12 {dimension_numbers = #tpu.dot_dimension_numbers<[1], [0], [0], [1], [0, 0, 1, 1], [], []>} : vector<16x128xbf16>, vector<128x128xbf16>, vector<16x128xf32> -> vector<16x128xf32>
    %14 = vector.broadcast %1 : vector<1x128xf32> to vector<16x128xf32>
    %15 = arith.addf %13, %14 : vector<16x128xf32>
    %cst_13 = arith.constant 0.000000e+00 : f32
    %16 = vector.broadcast %cst_13 : f32 to vector<16x128xf32>
    %17 = arith.maximumf %15, %16 : vector<16x128xf32>
    %18 = arith.truncf %17 : vector<16x128xf32> to vector<16x128xbf16>
    %c0_14 = arith.constant 0 : index
    %c0_15 = arith.constant 0 : index
    %19 = vector.load %arg6[%c0_14, %c0_15] : memref<128x128xbf16, #tpu.memory_space<vmem>>, vector<128x128xbf16>
    %cst_16 = arith.constant dense<0.000000e+00> : vector<16x128xf32>
    %20 = tpu.matmul %18, %19, %cst_16 {dimension_numbers = #tpu.dot_dimension_numbers<[1], [0], [0], [1], [0, 0, 1, 1], [], []>} : vector<16x128xbf16>, vector<128x128xbf16>, vector<16x128xf32> -> vector<16x128xf32>
    %21 = vector.broadcast %2 : vector<1x128xf32> to vector<16x128xf32>
    %22 = arith.addf %20, %21 : vector<16x128xf32>
    %23 = arith.truncf %22 : vector<16x128xf32> to vector<16x128xbf16>
    %c0_17 = arith.constant 0 : index
    %c0_18 = arith.constant 0 : index
    %24 = vector.load %arg8[%c0_17, %c0_18] : memref<16x128xbf16, #tpu.memory_space<vmem>>, vector<16x128xbf16>
    tpu.vector_store %arg8[%c0_17, %c0_18], %23 {strides = array<i32>} : memref<16x128xbf16, #tpu.memory_space<vmem>>, vector<16x128xbf16>,
    return
  }
  func.func @transform_0(%arg0: i32) -> (i32, i32) {
    %c0_i32 = arith.constant 0 : i32
    %c0_i32_0 = arith.constant 0 : i32
    return %arg0, %c0_i32 : i32, i32
  }
  func.func @transform_1(%arg0: i32) -> (i32, i32) {
    %c0_i32 = arith.constant 0 : i32
    %c0_i32_0 = arith.constant 0 : i32
    %c0_i32_1 = arith.constant 0 : i32
    return %c0_i32, %c0_i32_0 : i32, i32
  }
  func.func @transform_2(%arg0: i32) -> (i32, i32) {
    %c0_i32 = arith.constant 0 : i32
    %c0_i32_0 = arith.constant 0 : i32
    %c0_i32_1 = arith.constant 0 : i32
    return %c0_i32, %c0_i32_0 : i32, i32
  }
  func.func @transform_3(%arg0: i32) -> (i32, i32) {
    %c0_i32 = arith.constant 0 : i32
    %c0_i32_0 = arith.constant 0 : i32
    %c0_i32_1 = arith.constant 0 : i32
    return %c0_i32, %c0_i32_0 : i32, i32
  }
  func.func @transform_4(%arg0: i32) -> (i32, i32) {
    %c0_i32 = arith.constant 0 : i32
    %c0_i32_0 = arith.constant 0 : i32
    %c0_i32_1 = arith.constant 0 : i32
    return %c0_i32, %c0_i32_0 : i32, i32
  }
  func.func @transform_5(%arg0: i32) -> (i32, i32) {
    %c0_i32 = arith.constant 0 : i32
    %c0_i32_0 = arith.constant 0 : i32
    %c0_i32_1 = arith.constant 0 : i32
    return %c0_i32, %c0_i32_0 : i32, i32
  }
  func.func @transform_6(%arg0: i32) -> (i32, i32) {
    %c0_i32 = arith.constant 0 : i32
    %c0_i32_0 = arith.constant 0 : i32
    %c0_i32_1 = arith.constant 0 : i32
    return %c0_i32, %c0_i32_0 : i32, i32
  }
  func.func @transform_7(%arg0: i32) -> (i32, i32) {
    %c0_i32 = arith.constant 0 : i32
    %c0_i32_0 = arith.constant 0 : i32
    return %arg0, %c0_i32 : i32, i32
  }
}

</mosaic_0001>

<bundles_post_ra>
// kernel: tpu_custom_call.1
= control target key start
LH: loop header
LB: loop body
LE: loop exit
PB: predicated region body
PF: predicated region fallthrough
CT: control target
= control target key end

     0   :  { %12 = vsyncpa [#allocation3], 0  ;;  %s681_s0 = inlined_call_operand.hbm [shape: f32[4,64], index: 0, kind: input, shape index: {}]   ;;  %s682_s1 = inlined_call_operand.hbm [shape: bf16[64,128], index: 1, kind: input, shape index: {}]   ;;  %s683_s2 = inlined_call_operand.vmem [shape: f32[1,128], index: 2, kind: input, shape index: {}]   ;;  %s684_s3 = inlined_call_operand.hbm [shape: bf16[128,128], index: 3, kind: input, shape index: {}]   ;;  %s685_s4 = inlined_call_operand.vmem [shape: f32[1,128], index: 4, kind: input, shape index: {}]   ;;  %s686_s5 = inlined_call_operand.hbm [shape: bf16[128,128], index: 5, kind: input, shape index: {}]   ;;  %s687_s6 = inlined_call_operand.vmem [shape: f32[1,128], index: 6, kind: input, shape index: {}]   ;;  %s688_s7 = inlined_call_operand.hbm [shape: bf16[4,128], index: 7, kind: output, shape index: {}]  }
   0x1   :  { %13 = vsyncpa [#allocation6], 0 }
   0x2   :  { %14 = vsyncpa [#allocation9], 0 }
   0x3   :  { %15 = vsyncpa [#allocation4], 0 }
   0x4   :  { %19 = vsyncadd [#allocation3], 192  ;;  %s33_s26 = sshll.u32 %s682_s1, 4  ;;  %s608_s27 = smov [#allocation5]   ;;  %s34_s26 = int_to_ptr.hbm [resolvable:$true] %s33_s26 }
   0x5   :  { %s35_s28 = sshll.u32 %s608_s27, 4  ;;  %s20_s8 = sshll.u32 %s681_s0, 4  ;;  %s36_s28 = int_to_ptr.vmem [resolvable:$true] %s35_s28  ;;  %s21_s8 = int_to_ptr.hbm [resolvable:$true] %s20_s8 }
   0x6   :  { %s609_s9 = smov 64   ;;  %s610_s10 = smov 4  }
   0x7   :  { %41 = dma.hbm_to_vmem [thread:$0]  %s34_s26, 512, %s36_s28, [#allocation6], %s609_s9, %s609_s9, %s610_s10  }
   0x8   :  { %s611_s11 = smov [#allocation2]   ;;  %s48_s15 = sshll.u32 %s684_s3, 4  ;;  %s49_s15 = int_to_ptr.hbm [resolvable:$true] %s48_s15 }
   0x9   :  { %s22_s12 = sshll.u32 %s611_s11, 4  ;;  %s63_s17 = sshll.u32 %s686_s5, 4  ;;  %s23_s12 = int_to_ptr.vmem [resolvable:$true] %s22_s12  ;;  %s64_s17 = int_to_ptr.hbm [resolvable:$true] %s63_s17 }
   0xa   :  { %28 = dma.hbm_to_vmem [thread:$0]  %s21_s8, 64, %s23_s12, [#allocation3], %s609_s9, %s609_s9, %s610_s10  }
   0xb   :  { %s612_s18 = smov [#allocation7]   ;;  %s613_s0 = smov [#allocation8]  }
   0xc   :  { %s50_s19 = sshll.u32 %s612_s18, 4  ;;  %s65_s20 = sshll.u32 %s613_s0, 4  ;;  %s51_s19 = int_to_ptr.vmem [resolvable:$true] %s50_s19  ;;  %s66_s20 = int_to_ptr.vmem [resolvable:$true] %s65_s20 }
   0xd   :  { %56 = dma.hbm_to_vmem [thread:$0]  %s49_s15, 1024, %s51_s19, [#allocation6], %s609_s9, %s609_s9, %s610_s10  }
   0xe   :  { %71 = dma.hbm_to_vmem [thread:$0]  %s64_s17, 1024, %s66_s20, [#allocation9], %s609_s9, %s609_s9, %s610_s10  }
   0xf   :  { %600 = dma.done.wait [#allocation3], 256  }
  0x10   :  { %601 = vsyncadd [#allocation3], 4294967040 }
  0x11   :  { %602 = dma.done.wait [#allocation6], 1536  }
  0x12   :  { %603 = vsyncadd [#allocation6], 4294965760 }
  0x13   :  { %604 = dma.done.wait [#allocation9], 1024  }
  0x14   :  { %605 = vsyncadd [#allocation9], 4294966272  ;;  %v451_v0 = vld [vmem:[#allocation5 + $0x18] sm:$0xff]  ;;  %v450_v1 = vld [vmem:[#allocation5 + $0x10] sm:$0xff]  ;;  %vm132_vm0 = vcmask 523264   ;;  %vm324_vm1 = vcmask 1041408  }
  0x15   :  { %140 = vmatpush.bf16.msra.mxu0 %v451_v0  ;;  %v459_v2 = vld [vmem:[#allocation7 + $0x38] sm:$0xff]  ;;  %v458_v3 = vld [vmem:[#allocation7 + $0x30] sm:$0xff]  ;;  %v449_v4 = vld [vmem:[#allocation5 + $0x8] sm:$0xff]  ;;  %vm328_vm2 = vcmask 1043458  }
  0x16   :  { %220 = vmatpush.bf16.msra.mxu1 %v459_v2  ;;  %v457_v5 = vld [vmem:[#allocation7 + $0x28] sm:$0xff]  ;;  %v448_v6 = vld [vmem:[#allocation5] sm:$0xff]  ;;  %v94_v7 = vld [vmem:[#allocation2] sm:$0xff] }
  0x17   :  { %v95_v8 = vld [vmem:[#allocation2 + $0x8] sm:$0xff]  ;;  %v456_v9 = vld [vmem:[#allocation7 + $0x20] sm:$0xff]  ;;  %v454_v12 = vld [vmem:[#allocation7 + $0x10] sm:$0xff] }
  0x18   :  { %v96_v10 = vpack.c.bf16 %v95_v8, %v94_v7  ;;  %v455_v11 = vld [vmem:[#allocation7 + $0x18] sm:$0xff]  ;;  %v453_v13 = vld [vmem:[#allocation7 + $0x8] sm:$0xff]  ;;  %v452_v14 = vld [vmem:[#allocation7] sm:$0xff] }
  0x19   :  { %141 = vmatpush.bf16.msra.mxu0 %v450_v1  ;;  %v467_v15 = vld [vmem:[#allocation8 + $0x38] sm:$0xff]  ;;  %v466_v16 = vld [vmem:[#allocation8 + $0x30] sm:$0xff]  ;;  %v465_v17 = vld [vmem:[#allocation8 + $0x28] sm:$0xff] }
  0x1a   :  { %221 = vmatpush.bf16.msra.mxu1 %v458_v3  ;;  %304 = vmatpush.bf16.msra.mxu2 %v467_v15  ;;  %v464_v18 = vld [vmem:[#allocation8 + $0x20] sm:$0xff]  ;;  %v477_v20 = vld [vmem:[%s683_s2] ss:$0 sm:$0xff]  ;;  %v463_v27 = vld [vmem:[#allocation8 + $0x18] sm:$0xff] }
  0x1b   :  { %v462_v28 = vld [vmem:[#allocation8 + $0x10] sm:$0xff]  ;;  %v461_v29 = vld [vmem:[#allocation8 + $0x8] sm:$0xff]  ;;  %v460_v30 = vld [vmem:[#allocation8] sm:$0xff] }
  0x1c   :  { %v478_v32 = vld [vmem:[%s685_s4] ss:$0 sm:$0xff] }
  0x1d   :  { %142 = vmatpush.bf16.msra.mxu0 %v449_v4  ;;  %v479_v39 = vld [vmem:[%s687_s6] ss:$0 sm:$0xff] }
  0x1e   :  { %222 = vmatpush.bf16.msra.mxu1 %v457_v5  ;;  %305 = vmatpush.bf16.msra.mxu2 %v466_v16 }
  0x21   :  { %143 = vmatpush.bf16.msra.mxu0 %v448_v6 }
  0x22   :  { %223 = vmatpush.bf16.msra.mxu1 %v456_v9  ;;  %306 = vmatpush.bf16.msra.mxu2 %v465_v17 }
  0x24   :  { %383 = vmatmul.msk.bf16.vlgmr.msra.gmra.mxu0 %vm132_vm0, %v96_v10 }
  0x26   :  { %224 = vmatpush.bf16.msra.mxu1 %v455_v11  ;;  %307 = vmatpush.bf16.msra.mxu2 %v464_v18 }
  0x2a   :  { %225 = vmatpush.bf16.msra.mxu1 %v454_v12  ;;  %308 = vmatpush.bf16.msra.mxu2 %v463_v27 }
  0x2e   :  { %226 = vmatpush.bf16.msra.mxu1 %v453_v13  ;;  %309 = vmatpush.bf16.msra.mxu2 %v462_v28 }
  0x32   :  { %227 = vmatpush.bf16.msra.mxu1 %v452_v14  ;;  %310 = vmatpush.bf16.msra.mxu2 %v461_v29 }
  0x36   :  { %311 = vmatpush.bf16.msra.mxu2 %v460_v30 }
  0xa1   :  { %v145_v19 = vpop.f32.mrf.mxu0 }
  0xa2   :  { %v146_v21 = vadd.f32 %v477_v20, %v145_v19 }
  0xa4   :  { %v150_v24 = vmax.f32 %v146_v21, 0.0 }
  0xa9   :  { %v147_v22 = vpop.f32.mrf.mxu0 }
  0xaa   :  { %v148_v23 = vadd.f32 %v477_v20, %v147_v22 }
  0xac   :  { %v151_v25 = vmax.f32 %v148_v23, 0.0 }
  0xae   :  { %v152_v26 = vpack.c.bf16 %v151_v25, %v150_v24 }
  0xb0   :  { %228 = vmatmul.bf16.vlgmr.msra.gmra.mxu1 %v152_v26 }
 0x12d   :  { %v229_v31 = vpop.f32.mrf.mxu1 }
 0x12e   :  { %v230_v33 = vadd.f32 %v478_v32, %v229_v31 }
 0x130   :  { %v234_v36 = vmax.f32 %v230_v33, 0.0 }
 0x135   :  { %v231_v34 = vpop.f32.mrf.mxu1 }
 0x136   :  { %v232_v35 = vadd.f32 %v478_v32, %v231_v34 }
 0x138   :  { %v235_v37 = vmax.f32 %v232_v35, 0.0 }
 0x13a   :  { %v236_v38 = vpack.c.bf16 %v235_v37, %v234_v36 }
 0x13c   :  { %312 = vmatmul.bf16.vlgmr.msra.gmra.mxu2 %v236_v38 }
 0x1bf   :  { %v313_v40 = vpop.f32.mrf.mxu2 }
 0x1c0   :  { %v314_v41 = vadd.f32 %v479_v39, %v313_v40 }
 0x1c2   :  { %v318_v42 = vpack.c.bf16 %v314_v41, %v314_v41 }
 0x1c4   :  { %v322_v43 = vrot.slane %v318_v42, 2 }
 0x1c6   :  { %v327_v44 = vsel %vm324_vm1, %v318_v42, %v322_v43  ;;  %v329_v45 = vsel %vm328_vm2, %v318_v42, %v322_v43 }
 0x1c7   :  { %v331_v46 = vrot.slane %v329_v45, 2  ;;  %342 = vst [vmem:[#allocation10] sm:$0x3] %v327_v44  ;;  %v315_v47 = vpop.f32.mrf.mxu2 }
 0x1c8   :  { %v316_v48 = vadd.f32 %v479_v39, %v315_v47 }
 0x1c9   :  { %343 = vst [vmem:[#allocation10 + $0x2] sm:$0x3] %v331_v46 }
 0x1ca   :  { %v319_v49 = vpack.c.bf16 %v316_v48, %v316_v48 }
 0x1cc   :  { %v323_v50 = vrot.slane %v319_v49, 2 }
 0x1ce   :  { %v334_v51 = vsel %vm324_vm1, %v319_v49, %v323_v50  ;;  %v335_v52 = vsel %vm328_vm2, %v319_v49, %v323_v50 }
 0x1cf   :  { %v337_v53 = vrot.slane %v335_v52, 2  ;;  %344 = vst [vmem:[#allocation10 + $0x4] sm:$0x3] %v334_v51 }
 0x1d1   :  { %345 = vst [vmem:[#allocation10 + $0x6] sm:$0x3] %v337_v53 }
 0x1d2   :  { %349 = vsyncadd [#allocation4], 96  ;;  %s352_s24 = sshll.u32 %s688_s7, 4  ;;  %s614_s25 = smov [#allocation10]   ;;  %s353_s24 = int_to_ptr.hbm [resolvable:$true] %s352_s24 }
 0x1d3   :  { %s350_s26 = sshll.u32 %s614_s25, 4  ;;  %s615_s27 = smov 32   ;;  %s351_s26 = int_to_ptr.vmem [resolvable:$true] %s350_s26 }
 0x1d4   :  { %s616_s28 = smov 2  }
 0x1d5   :  { %358 = dma.vmem_to_hbm [thread:$0]  %s351_s26, 32, %s353_s24, [#allocation4], %s615_s27, %s615_s27, %s616_s28  }
 0x1d6   :  { %606 = dma.done.wait [#allocation4], 128  }
 0x1d7   :  { %607 = vsyncadd [#allocation4], 4294967168 }
 0x1d8   :  { %363 = vsyncpa [#allocation3], 1 }
 0x1d9   :  { %364 = vsyncpa [#allocation6], 1 }
 0x1da   :  { %365 = vsyncpa [#allocation9], 1 }
 0x1db   :  { %366 = vsyncpa [#allocation4], 1 }

</bundles_post_ra>
